<compile_context>
chip_gen: v5e
topology: v5e:2x2
jax: 0.10.0
libtpu: 0.0.40
codegen_flags: <defaults>
</compile_context>

<pallas_src>
import math

import jax
import jax.numpy as jnp
from jax.experimental import pallas as pl
from jax.experimental.pallas import tpu as pltpu


def _round_up(a, b):
    return ((a + b - 1) // b) * b


def _make_pinn_kernel(n_layers, use_bf16_tanh=False):
    """Build a kernel closure for an MLP with `n_layers` Linear layers."""

    def kernel(x_ref, *refs):
        # refs = (w0, b0, w1, b1, ..., w_{L-1}, b_{L-1}, out)
        out_ref = refs[-1]
        param_refs = refs[:-1]
        h = x_ref[...]                           # (d_in, tile_n), batch on lanes
        for i in range(n_layers):
            w = param_refs[2 * i][...]           # (out_i, in_i)  PyTorch layout
            b = param_refs[2 * i + 1][...]       # (out_i, 1)
            in_i = w.shape[1]
            if in_i <= 8:
                # Tiny contraction dim (e.g. d_in = 2): a K=2 systolic matmul
                # wastes the MXU; do broadcast mult-adds on the VPU instead.
                # (The explicit value broadcast is kept -- portable -- and this
                # layer sits far under the EUP-bound critical path anyway.)
                z = b
                for j in range(in_i):
                    z = z + w[:, j:j + 1] * h[j:j + 1, :]
            else:
                # MXU path.  Kernel is EUP(tanh)-bound, so MXU/VPU have large
                # slack; no further matmul-shape tuning is useful.
                z = jnp.dot(w, h, preferred_element_type=jnp.float32) + b
            if i < n_layers - 1:                 # tanh on all but the last layer
                if use_bf16_tanh:
                    # Optional bf16 transcendental path (v6e/v7x EUP only);
                    # matmul accumulation stays f32.  Off by default.
                    z = jnp.tanh(z.astype(jnp.bfloat16)).astype(jnp.float32)
                else:
                    z = jnp.tanh(z)
            h = z
        out_ref[...] = h.astype(out_ref.dtype)   # (d_out, tile_n), lane-dense

    return kernel


def pinn_forward_t(x_t, weights, biases, *, tile_n=8192, use_bf16_tanh=False):
    """PINN forward on the transposed (batch-on-lanes) layout.

    Preferred entry point: keeps wrapper HBM traffic to a cheap zero pad
    (no transpose pass).  Keep collocation points transposed upstream.

    Args:
      x_t:      (d_in, N) float32
      weights:  list of (out_i, in_i) float32 arrays (PyTorch nn.Linear layout)
      biases:   list of (out_i, 1) float32 arrays
      tile_n:   batch columns per grid step (rounded to a multiple of 128)
      use_bf16_tanh: run tanh in bf16 (v6e/v7x only; keep False on v5e)
    Returns:
      (d_out, N) float32
    """
    n_layers = len(weights)
    d_in, N = x_t.shape
    d_out = weights[-1].shape[0]
    max_w = max([d_in, d_out] + [w.shape[0] for w in weights])
    n_params = sum(w.size + b.size for w, b in zip(weights, biases))

    # ---- Tile sizing ------------------------------------------------------
    n_pad = max(_round_up(N, 128), 128)
    tile_n = max(min(_round_up(tile_n, 128), n_pad), 128)

    # VMEM cap, derived against v7x (64 MiB physical / 32 MiB scoped default):
    # double-buffered I/O blocks + resident params + ~3 live (max_w, tile_n)
    # f32 intermediates must stay comfortably below the scoped default.
    vmem_budget = 24 << 20
    bytes_per_col = 4 * (2 * (d_in + d_out) + 3 * max_w)
    tile_cap = max((vmem_budget - 8 * n_params) // bytes_per_col, 128)
    tile_n = max(min(tile_n, (tile_cap // 128) * 128), 128)

    # Megacore: guarantee >=2 grid steps so v7x's two TensorCores both get
    # batch tiles ("parallel" grid axis).  Costs one extra ~0.35 us step on
    # single-TC v5e/v6e -- negligible.
    if n_pad >= 256:
        tile_n = min(tile_n, _round_up(n_pad // 2, 128))

    n_pad = _round_up(n_pad, tile_n)
    grid = (n_pad // tile_n,)

    # Cheap pad only (d_in rows wide); no transpose in the wrapper.
    if n_pad != N:
        x_t = jnp.pad(x_t, ((0, 0), (0, n_pad - N)))

    in_specs = [pl.BlockSpec((d_in, tile_n), lambda i: (0, i))]
    flat_params = []
    for w, b in zip(weights, biases):
        # Full-block (untiled) weight / bias; same block every grid step.
        in_specs.append(pl.BlockSpec(w.shape, lambda i: (0, 0)))
        in_specs.append(pl.BlockSpec(b.shape, lambda i: (0, 0)))
        flat_params += [w, b]

    out_spec = pl.BlockSpec((d_out, tile_n), lambda i: (0, i))

    # Only raise the scoped-VMEM limit when the footprint estimate needs it;
    # never exceed v7x's 64 MiB physical.
    vmem_est = bytes_per_col * tile_n + 8 * n_params
    vmem_limit = None
    if vmem_est > vmem_budget:
        vmem_limit = min(int(vmem_est * 1.25), 56 << 20)

    # Advisory cost hint so XLA schedules surrounding ops sensibly.
    hidden_widths = [w.shape[0] for w in weights[:-1]]
    cost = pl.CostEstimate(
        flops=2 * n_pad * sum(w.shape[0] * w.shape[1] for w in weights),
        transcendentals=n_pad * sum(hidden_widths),
        bytes_accessed=4 * (n_pad * (d_in + d_out) + n_params),
    )

    kernel = _make_pinn_kernel(n_layers, use_bf16_tanh=use_bf16_tanh)

    out_t = pl.pallas_call(
        kernel,
        out_shape=jax.ShapeDtypeStruct((d_out, n_pad), jnp.float32),
        grid_spec=pltpu.PrefetchScalarGridSpec(
            num_scalar_prefetch=0,
            grid=grid,
            in_specs=in_specs,
            out_specs=out_spec,
        ),
        compiler_params=pltpu.CompilerParams(
            # Batch tiles are independent -> shard across v7x's 2 TensorCores.
            dimension_semantics=("parallel",),
            vmem_limit_bytes=vmem_limit,
        ),
        cost_estimate=cost,
    )(x_t, *flat_params)

    # Drop batch padding; stay in the transposed layout.
    return out_t[:, :N]


def pinn_forward(x, weights, biases, *, tile_n=8192, use_bf16_tanh=False):
    """PyTorch-module-compatible API: x (N, d_in) -> (N, d_out).

    Prefer pinn_forward_t and keep points transposed upstream: the transposes
    here are separate XLA HBM passes on top of the kernel's ~12 B/point.
    """
    out_t = pinn_forward_t(x.T, weights, biases, tile_n=tile_n,
                           use_bf16_tanh=use_bf16_tanh)
    return out_t.T


def init_pinn_params(layers, key):
    """nn.Linear-style init: U(-1/sqrt(fan_in), 1/sqrt(fan_in)), native layout."""
    weights, biases = [], []
    for i in range(len(layers) - 1):
        fan_in, fan_out = layers[i], layers[i + 1]
        key, kw, kb = jax.random.split(key, 3)
        bound = 1.0 / math.sqrt(fan_in)
        # PyTorch layout: W is (out, in); bias stored as a (out, 1) column.
        w = jax.random.uniform(kw, (fan_out, fan_in), jnp.float32,
                               minval=-bound, maxval=bound)
        b = jax.random.uniform(kb, (fan_out, 1), jnp.float32,
                               minval=-bound, maxval=bound)
        weights.append(w)
        biases.append(b)
    return weights, biases


def pinn_reference(x, weights, biases):
    """Pure-JAX reference of PINN.forward (y = x @ W.T + b) for correctness."""
    h = x
    for i in range(len(weights) - 1):
        h = jnp.tanh(h @ weights[i].T + biases[i].T)
    return h @ weights[-1].T + biases[-1].T


if __name__ == "__main__":
    # PINN(layers=[2, 32, 32, 32, 1]): typical (x, t) -> u(x, t) network.
    layers = [2, 32, 32, 32, 1]
    key = jax.random.PRNGKey(0)
    key, kx = jax.random.split(key)

    N = 256                                   # small batch of collocation points
    x = jax.random.normal(kx, (N, layers[0]), jnp.float32)
    weights, biases = init_pinn_params(layers, key)

    # Preferred transposed API (wrapper adds only the pad).  With N=256 the
    # tile clamp yields tile_n=128, grid=2 -> exercises the megacore split.
    out_t = pinn_forward_t(x.T, weights, biases)
    out_t = jax.block_until_ready(out_t)

    # PyTorch-module-compatible API.
    out = pinn_forward(x, weights, biases)
    out = jax.block_until_ready(out)

    ref = pinn_reference(x, weights, biases)
    assert out_t.shape == (layers[-1], N)
    assert out.shape == (N, layers[-1])
    assert jnp.allclose(out_t.T, ref, atol=1e-5, rtol=1e-5), "mismatch (transposed API)"
    assert jnp.allclose(out, ref, atol=1e-5, rtol=1e-5), "mismatch (compat API)"

    print("KERNEL_OK")
</pallas_src>

<mosaic_0001>
module attributes {stable_mosaic.version = 11 : i64} {
  func.func @kernel(%arg0: i32, %arg1: memref<2x128xf32, #tpu.memory_space<vmem>>, %arg2: memref<32x2xf32, #tpu.memory_space<vmem>>, %arg3: memref<32x1xf32, #tpu.memory_space<vmem>>, %arg4: memref<32x32xf32, #tpu.memory_space<vmem>>, %arg5: memref<32x1xf32, #tpu.memory_space<vmem>>, %arg6: memref<32x32xf32, #tpu.memory_space<vmem>>, %arg7: memref<32x1xf32, #tpu.memory_space<vmem>>, %arg8: memref<1x32xf32, #tpu.memory_space<vmem>>, %arg9: memref<1x1xf32, #tpu.memory_space<vmem>>, %arg10: memref<1x128xf32, #tpu.memory_space<vmem>>) attributes {dimension_semantics = [#tpu.dimension_semantics<parallel>], iteration_bounds = array<i64: 2>, scalar_prefetch = 0 : i64, scratch_operands = 0 : i64, tpu.core_type = #tpu.core_type<tc>, window_params = [{transform_indices = @transform_0, window_bounds = array<i64: 2, 128>}, {pipeline_mode = #tpu.pipeline_mode<synchronous>, transform_indices = @transform_1, window_bounds = array<i64: 32, 2>}, {pipeline_mode = #tpu.pipeline_mode<synchronous>, transform_indices = @transform_2, window_bounds = array<i64: 32, 1>}, {pipeline_mode = #tpu.pipeline_mode<synchronous>, transform_indices = @transform_3, window_bounds = array<i64: 32, 32>}, {pipeline_mode = #tpu.pipeline_mode<synchronous>, transform_indices = @transform_4, window_bounds = array<i64: 32, 1>}, {pipeline_mode = #tpu.pipeline_mode<synchronous>, transform_indices = @transform_5, window_bounds = array<i64: 32, 32>}, {pipeline_mode = #tpu.pipeline_mode<synchronous>, transform_indices = @transform_6, window_bounds = array<i64: 32, 1>}, {pipeline_mode = #tpu.pipeline_mode<synchronous>, transform_indices = @transform_7, window_bounds = array<i64: 1, 32>}, {pipeline_mode = #tpu.pipeline_mode<synchronous>, transform_indices = @transform_8, window_bounds = array<i64: 1, 1>}, {transform_indices = @transform_9, window_bounds = array<i64: 1, 128>}]} {
    %c0 = arith.constant 0 : index
    %c0_0 = arith.constant 0 : index
    %0 = vector.load %arg1[%c0, %c0_0] : memref<2x128xf32, #tpu.memory_space<vmem>>, vector<2x128xf32>
    %c0_1 = arith.constant 0 : index
    %c0_2 = arith.constant 0 : index
    %1 = vector.load %arg2[%c0_1, %c0_2] : memref<32x2xf32, #tpu.memory_space<vmem>>, vector<32x2xf32>
    %c0_3 = arith.constant 0 : index
    %c0_4 = arith.constant 0 : index
    %2 = vector.load %arg3[%c0_3, %c0_4] : memref<32x1xf32, #tpu.memory_space<vmem>>, vector<32x1xf32>
    %3 = vector.extract_strided_slice %1 {offsets = [0, 0], sizes = [32, 1], strides = [1, 1]} : vector<32x2xf32> to vector<32x1xf32>
    %4 = vector.extract_strided_slice %0 {offsets = [0, 0], sizes = [1, 128], strides = [1, 1]} : vector<2x128xf32> to vector<1x128xf32>
    %5 = vector.broadcast %3 : vector<32x1xf32> to vector<32x128xf32>
    %6 = vector.broadcast %4 : vector<1x128xf32> to vector<32x128xf32>
    %7 = arith.mulf %5, %6 : vector<32x128xf32>
    %8 = vector.broadcast %2 : vector<32x1xf32> to vector<32x128xf32>
    %9 = arith.addf %8, %7 : vector<32x128xf32>
    %10 = vector.extract_strided_slice %1 {offsets = [0, 1], sizes = [32, 1], strides = [1, 1]} : vector<32x2xf32> to vector<32x1xf32>
    %11 = vector.extract_strided_slice %0 {offsets = [1, 0], sizes = [1, 128], strides = [1, 1]} : vector<2x128xf32> to vector<1x128xf32>
    %12 = vector.broadcast %10 : vector<32x1xf32> to vector<32x128xf32>
    %13 = vector.broadcast %11 : vector<1x128xf32> to vector<32x128xf32>
    %14 = arith.mulf %12, %13 : vector<32x128xf32>
    %15 = arith.addf %9, %14 : vector<32x128xf32>
    %16 = math.tanh %15 : vector<32x128xf32>
    %c0_5 = arith.constant 0 : index
    %c0_6 = arith.constant 0 : index
    %17 = vector.load %arg4[%c0_5, %c0_6] : memref<32x32xf32, #tpu.memory_space<vmem>>, vector<32x32xf32>
    %c0_7 = arith.constant 0 : index
    %c0_8 = arith.constant 0 : index
    %18 = vector.load %arg5[%c0_7, %c0_8] : memref<32x1xf32, #tpu.memory_space<vmem>>, vector<32x1xf32>
    %cst = arith.constant dense<0.000000e+00> : vector<32x128xf32>
    %19 = tpu.matmul %17, %16, %cst {dimension_numbers = #tpu.dot_dimension_numbers<[1], [0], [0], [1], [0, 0, 1, 1], [], []>} : vector<32x32xf32>, vector<32x128xf32>, vector<32x128xf32> -> vector<32x128xf32>
    %20 = vector.broadcast %18 : vector<32x1xf32> to vector<32x128xf32>
    %21 = arith.addf %19, %20 : vector<32x128xf32>
    %22 = math.tanh %21 : vector<32x128xf32>
    %c0_9 = arith.constant 0 : index
    %c0_10 = arith.constant 0 : index
    %23 = vector.load %arg6[%c0_9, %c0_10] : memref<32x32xf32, #tpu.memory_space<vmem>>, vector<32x32xf32>
    %c0_11 = arith.constant 0 : index
    %c0_12 = arith.constant 0 : index
    %24 = vector.load %arg7[%c0_11, %c0_12] : memref<32x1xf32, #tpu.memory_space<vmem>>, vector<32x1xf32>
    %cst_13 = arith.constant dense<0.000000e+00> : vector<32x128xf32>
    %25 = tpu.matmul %23, %22, %cst_13 {dimension_numbers = #tpu.dot_dimension_numbers<[1], [0], [0], [1], [0, 0, 1, 1], [], []>} : vector<32x32xf32>, vector<32x128xf32>, vector<32x128xf32> -> vector<32x128xf32>
    %26 = vector.broadcast %24 : vector<32x1xf32> to vector<32x128xf32>
    %27 = arith.addf %25, %26 : vector<32x128xf32>
    %28 = math.tanh %27 : vector<32x128xf32>
    %c0_14 = arith.constant 0 : index
    %c0_15 = arith.constant 0 : index
    %29 = vector.load %arg8[%c0_14, %c0_15] : memref<1x32xf32, #tpu.memory_space<vmem>>, vector<1x32xf32>
    %c0_16 = arith.constant 0 : index
    %c0_17 = arith.constant 0 : index
    %30 = vector.load %arg9[%c0_16, %c0_17] : memref<1x1xf32, #tpu.memory_space<vmem>>, vector<1x1xf32>
    %cst_18 = arith.constant dense<0.000000e+00> : vector<1x128xf32>
    %31 = tpu.matmul %29, %28, %cst_18 {dimension_numbers = #tpu.dot_dimension_numbers<[1], [0], [0], [1], [0, 0, 1, 1], [], []>} : vector<1x32xf32>, vector<32x128xf32>, vector<1x128xf32> -> vector<1x128xf32>
    %32 = vector.broadcast %30 : vector<1x1xf32> to vector<1x128xf32>
    %33 = arith.addf %31, %32 : vector<1x128xf32>
    %c0_19 = arith.constant 0 : index
    %c0_20 = arith.constant 0 : index
    %34 = vector.load %arg10[%c0_19, %c0_20] : memref<1x128xf32, #tpu.memory_space<vmem>>, vector<1x128xf32>
    tpu.vector_store %arg10[%c0_19, %c0_20], %33 {strides = array<i32>} : memref<1x128xf32, #tpu.memory_space<vmem>>, vector<1x128xf32>,
    return
  }
  func.func @transform_0(%arg0: i32) -> (i32, i32) {
    %c0_i32 = arith.constant 0 : i32
    %c0_i32_0 = arith.constant 0 : i32
    return %c0_i32, %arg0 : i32, i32
  }
  func.func @transform_1(%arg0: i32) -> (i32, i32) {
    %c0_i32 = arith.constant 0 : i32
    %c0_i32_0 = arith.constant 0 : i32
    %c0_i32_1 = arith.constant 0 : i32
    return %c0_i32, %c0_i32_0 : i32, i32
  }
  func.func @transform_2(%arg0: i32) -> (i32, i32) {
    %c0_i32 = arith.constant 0 : i32
    %c0_i32_0 = arith.constant 0 : i32
    %c0_i32_1 = arith.constant 0 : i32
    return %c0_i32, %c0_i32_0 : i32, i32
  }
  func.func @transform_3(%arg0: i32) -> (i32, i32) {
    %c0_i32 = arith.constant 0 : i32
    %c0_i32_0 = arith.constant 0 : i32
    %c0_i32_1 = arith.constant 0 : i32
    return %c0_i32, %c0_i32_0 : i32, i32
  }
  func.func @transform_4(%arg0: i32) -> (i32, i32) {
    %c0_i32 = arith.constant 0 : i32
    %c0_i32_0 = arith.constant 0 : i32
    %c0_i32_1 = arith.constant 0 : i32
    return %c0_i32, %c0_i32_0 : i32, i32
  }
  func.func @transform_5(%arg0: i32) -> (i32, i32) {
    %c0_i32 = arith.constant 0 : i32
    %c0_i32_0 = arith.constant 0 : i32
    %c0_i32_1 = arith.constant 0 : i32
    return %c0_i32, %c0_i32_0 : i32, i32
  }
  func.func @transform_6(%arg0: i32) -> (i32, i32) {
    %c0_i32 = arith.constant 0 : i32
    %c0_i32_0 = arith.constant 0 : i32
    %c0_i32_1 = arith.constant 0 : i32
    return %c0_i32, %c0_i32_0 : i32, i32
  }
  func.func @transform_7(%arg0: i32) -> (i32, i32) {
    %c0_i32 = arith.constant 0 : i32
    %c0_i32_0 = arith.constant 0 : i32
    %c0_i32_1 = arith.constant 0 : i32
    return %c0_i32, %c0_i32_0 : i32, i32
  }
  func.func @transform_8(%arg0: i32) -> (i32, i32) {
    %c0_i32 = arith.constant 0 : i32
    %c0_i32_0 = arith.constant 0 : i32
    %c0_i32_1 = arith.constant 0 : i32
    return %c0_i32, %c0_i32_0 : i32, i32
  }
  func.func @transform_9(%arg0: i32) -> (i32, i32) {
    %c0_i32 = arith.constant 0 : i32
    %c0_i32_0 = arith.constant 0 : i32
    return %c0_i32, %arg0 : i32, i32
  }
}

</mosaic_0001>

<bundles_post_ra>
// kernel: tpu_custom_call.1
= control target key start
LH: loop header
LB: loop body
LE: loop exit
PB: predicated region body
PF: predicated region fallthrough
CT: control target
= control target key end

     0   :  { %s1049_s0 = inlined_call_operand.vmem [shape: f32[2,256], index: 0, kind: input, shape index: {}]   ;;  %s1050_s1 = inlined_call_operand.vmem [shape: f32[32,2], index: 1, kind: input, shape index: {}]   ;;  %s1051_s2 = inlined_call_operand.vmem [shape: f32[32,1], index: 2, kind: input, shape index: {}]   ;;  %s1052_s3 = inlined_call_operand.vmem [shape: f32[32,32], index: 3, kind: input, shape index: {}]   ;;  %s1053_s4 = inlined_call_operand.vmem [shape: f32[32,1], index: 4, kind: input, shape index: {}]   ;;  %s1054_s5 = inlined_call_operand.vmem [shape: f32[32,32], index: 5, kind: input, shape index: {}]   ;;  %s1055_s6 = inlined_call_operand.vmem [shape: f32[32,1], index: 6, kind: input, shape index: {}]   ;;  %s1056_s7 = inlined_call_operand.vmem [shape: f32[1,32], index: 7, kind: input, shape index: {}]   ;;  %s1057_s8 = inlined_call_operand.<no memory space> [shape: f32[1,1], index: 8, kind: input, shape index: {}]   ;;  %s1058_s9 = inlined_call_operand.hbm [shape: f32[1,256], index: 9, kind: output, shape index: {}]  }
   0x1   :  { %v14_v0 = vstv %s1057_s8 }
   0x2   :  { %15 = vst [vmem:[#allocation2] sm:$0x1] %v14_v0 }
   0x3   :  { %16 = vsyncpa [#allocation4], 0 }
   0x4   :  { %18 = vsyncpa [#allocation4 + $0x1], 0  ;;  %s880_s11 = smov 0   ;;  %s882_s12 = smov 0  }
   0x5   :  { %s884_s13 = smov 0   ;;  %s886_s14 = smov 0  }
   0x6 LB: > { %s901_s8 = sadd.s32 4294967295, %s823_s14   ;;  %s663_s15 = sadd.s32 4294967294, %s823_s14   ;;  %s823_s14 = sphi %s886_s14, %s1064_s14   ;;  %s819_s13 = sphi %s884_s13, %s1063_s13   ;;  %s815_s12 = sphi %s882_s12, %s1062_s12   ;;  %s811_s11 = sphi %s880_s11, %s1061_s11  }
   0x7   : > { %s905_s16 = sadd.s32 1, %s823_s14   ;;  %s225_s17 = sadd.s32 1, %s819_s13 }
   0x8   : > { %s222_s18 = ssub.s32 %s823_s14, %s905_s16  ;;  %p235_p0 = scmp.ne.s32.totalorder %s819_s13, %s815_s12 }
   0x9   : > { %p223_p1 = scmp.eq.s32.totalorder %s222_s18, 0  ;;  %p236_p2 = scmp.eq.s32.totalorder %s901_s8, 1 }
   0xa   : > { %p241_p3 = scmp.ne.s32.totalorder %s815_s12, %s811_s11  ;;  %p242_p4 = scmp.eq.s32.totalorder %s663_s15, 1 }
   0xb   : > { %s916_s19 = scalar_select %p223_p1, %s819_s13, %s225_s17  }
   0xc   : > { %p918_p5 = por %p236_p2, %p235_p0  ;;  %p922_p6 = por %p242_p4, %p241_p3 }
   0xd   : > { %p666_p7 = scmp.ge.s32.totalorder %s823_s14, 1  ;;  %p291_p8 = scmp.lt.s32.totalorder %s823_s14, 3 }
   0xf   : > { %p292_p9 = pnand %p666_p7, %p291_p8 }
  0x10   : > { %p325_p10 = scmp.lt.s32.totalorder (!%p292_p9), %s901_s8, 1  ;;  %s323_s25 = sand.u32 (!%p292_p9), 1, %s815_s12  }
  0x11   : > { %295 = sbr.rel (%p292_p9) target bundleno = 640 (0x280), region = 56  ;;  %s604_s28 = scalar_lea.hbm (!%p292_p9), %s1058_s9, %s901_s8 }
  0x12   : > { %s324_s29 = scalar_lea.vmem (!%p292_p9), [#allocation3], %s323_s25  ;;  %s781_s23 = scalar_lea.hbm (!%p292_p9), %s1058_s9, 2 }
  0x13   : > { %s606_s30 = sshll.u32 (!%p292_p9), %s324_s29, 4  ;;  %s607_s30 = int_to_ptr.vmem [resolvable:$true] %s606_s30 }
  0x16   : > { %v337_v1 = vld [vmem:[%s1051_s2 + $0x18] sm:$0xff]  ;;  %v331_v3 = vld [vmem:[%s1050_s1 + $0x8] sm:$0xff]  ;;  %v825_v4 = vmov 0   ;;  %v332_v5 = vld [vmem:[%s1050_s1 + $0x10] sm:$0xff]  ;;  %v826_v7 = vmov 1   ;;  %s326_s10 = scalar_select %p325_p10, %s901_s8, 1 }
  0x17   : > { %v333_v2 = vld [vmem:[%s1050_s1 + $0x18] sm:$0xff]  ;;  %731 = vset.pattern.permute.xlu2 %v825_v4  ;;  %729 = vset.pattern.permute.xlu1 %v825_v4  ;;  %v336_v6 = vld [vmem:[%s1051_s2 + $0x10] sm:$0xff]  ;;  %v335_v8 = vld [vmem:[%s1051_s2 + $0x8] sm:$0xff]  ;;  %vm444_vm0 = vcmask 261120  }
  0x18   : > { %728 = vset.pattern.permute.xlu0 %v825_v4  ;;  %380 = vperm.xlu1 %729, %v337_v1   ;;  %v330_v9 = vld [vmem:[%s1050_s1] sm:$0xff]  ;;  %v422_v11 = vld [vmem:[%s1053_s4 + $0x10] sm:$0xff]  ;;  %v497_v12 = vld [vmem:[%s1055_s6 + $0x18] sm:$0xff]  ;;  %s667_s15 = sshll.u32 %s326_s10, 1  ;;  %s608_s10 = sshll.u32 %s604_s28, 4  ;;  %s609_s10 = int_to_ptr.hbm [resolvable:$true] %s608_s10 }
  0x19   : > { %355 = vperm.xlu0 %728, %v333_v2   ;;  %345 = vperm.xlu2 %731, %v331_v3   ;;  %v334_v10 = vld [vmem:[%s1051_s2] sm:$0xff]  ;;  %v495_v13 = vld [vmem:[%s1055_s6 + $0x8] sm:$0xff]  ;;  %s328_s22 = scalar_lea.vmem %s1049_s0, %s667_s15  ;;  %v423_v26 = vld [vmem:[%s1053_s4 + $0x18] sm:$0xff]  ;;  %s596_s15 = scalar_lea.sflag [#allocation4], %s323_s25 }
  0x1a   : > { %v329_v15 = vld [vmem:[%s328_s22] sm:$0x3]  ;;  %v421_v41 = vld [vmem:[%s1053_s4 + $0x8] sm:$0xff]  ;;  %v496_v42 = vld [vmem:[%s1055_s6 + $0x10] sm:$0xff]  ;;  %s775_s17 = sshra.s32 %s609_s10, 4  ;;  %s776_s17 = int_to_ptr.hbm [resolvable:$true] %s775_s17 }
  0x1b   : > { %v358_v18 = vperm.slane %v329_v15, 0  ;;  %v403_v20 = vperm.slane %v329_v15, 1  ;;  %v420_v34 = vld [vmem:[%s1053_s4] sm:$0xff]  ;;  %v417_v54 = vld [vmem:[%s1052_s3 + $0x8] sm:$0xff]  ;;  %v418_v57 = vld [vmem:[%s1052_s3 + $0x10] sm:$0xff]  ;;  %s777_s18 = scalar_lea.hbm %s776_s17, 1  ;;  %p782_p0 = scmp.lt.s32.totalorder %s776_s17, %s1058_s9 }
  0x1c   : > { %v564_v51 = vld [vmem:[#allocation2] sm:$0x1]  ;;  %v419_v58 = vld [vmem:[%s1052_s3 + $0x18] sm:$0xff]  ;;  %p778_p11 = scmp.ne.s32.totalorder %s776_s17, %s777_s18  ;;  %p783_p1 = scmp.lt.s32.totalorder %s781_s23, %s777_s18 }
  0x1d   : > { %v494_v52 = vld [vmem:[%s1055_s6] sm:$0xff] }
  0x1e   : > { %v416_v55 = vld [vmem:[%s1052_s3] sm:$0xff]  ;;  %p779_p12 = pnand %p778_p11, %p918_p5  ;;  %p784_p2 = por %p783_p1, %p782_p0 }
  0x20   : > { %730 = vset.pattern.permute.xlu1 %v826_v7  ;;  %p780_p13 = pneg %p779_p12 }
  0x21   : > { %350 = vperm.xlu0 %728, %v332_v5   ;;  %375 = vperm.xlu2 %731, %v336_v6  }
  0x22   : > { %400 = vperm.xlu1 %730, %v333_v2   ;;  %p785_p3 = pnand %p784_p2, %p780_p13 }
  0x29   : > { %732 = vset.pattern.permute.xlu0 %v826_v7  ;;  %370 = vperm.xlu2 %731, %v335_v8  }
  0x2a   : > { %733 = vset.pattern.permute.xlu1 %v825_v4  ;;  %396 = vperm.xlu0 %732, %v332_v5  }
  0x2b   : > { %340 = vperm.xlu1 %733, %v330_v9  }
  0x31   : > { %365 = vperm.xlu2 %731, %v334_v10   ;;  %v490_v10 = vld [vmem:[%s1054_s5] sm:$0xff] }
  0x32   : > { %388 = vperm.xlu0 %732, %v330_v9  }
  0x33   : > { %734 = vset.pattern.permute.xlu1 %v826_v7 }
  0x34   : > { %392 = vperm.xlu1 %734, %v331_v3  }
  0x39   : > { %436 = vperm.xlu2 %731, %v422_v11   ;;  %v491_v11 = vld [vmem:[%s1054_s5 + $0x8] sm:$0xff] }
  0x3a   : > { %736 = vset.pattern.permute.xlu0 %v825_v4 }
  0x3b   : > { %431 = vperm.xlu0 %736, %v421_v41  }
  0x3c   : > { %735 = vset.pattern.permute.xlu1 %v825_v4 }
  0x3d   : > { %441 = vperm.xlu1 %735, %v423_v26  }
  0x41   : > { %515 = vperm.xlu2 %731, %v497_v12  }
  0x43   : > { %500 = vperm.xlu0 %736, %v494_v52  }
  0x45   : > { %426 = vperm.xlu1 %735, %v420_v34  }
  0x49   : > { %505 = vperm.xlu2 %731, %v495_v13   ;;  %v492_v13 = vld [vmem:[%s1054_s5 + $0x10] sm:$0xff] }
  0x4d   : > { %510 = vperm.xlu1 %735, %v496_v42  }
  0x55   : > { %567 = vperm.xlu1 %735, %v564_v51  }
  0x73   : > { %v346_v14 = vpop.permute.xlu2 %345 }
  0x74   : > { %v360_v37 = vmul.f32 %v358_v18, %v346_v14  ;;  %v493_v14 = vld [vmem:[%s1054_s5 + $0x18] sm:$0xff] }
  0x7b   : > { %v376_v21 = vpop.permute.xlu2 %375 }
  0x83   : > { %v371_v29 = vpop.permute.xlu2 %370 }
  0x84   : > { %v384_v46 = vadd.f32 %v371_v29, %v360_v37 }
  0x8a   : > { %v381_v16 = vpop.permute.xlu1 %380 }
  0x8b   : > { %v356_v17 = vpop.permute.xlu0 %355  ;;  %v366_v43 = vpop.permute.xlu2 %365 }
  0x8c   : > { %v362_v19 = vmul.f32 %v358_v18, %v356_v17 }
  0x8e   : > { %v386_v24 = vadd.f32 %v381_v16, %v362_v19 }
  0x93   : > { %v351_v22 = vpop.permute.xlu0 %350  ;;  %v437_v62 = vpop.permute.xlu2 %436 }
  0x94   : > { %v401_v23 = vpop.permute.xlu1 %400  ;;  %v361_v28 = vmul.f32 %v358_v18, %v351_v22 }
  0x95   : > { %v407_v25 = vmul.f32 %v403_v20, %v401_v23 }
  0x96   : > { %v385_v31 = vadd.f32 %v376_v21, %v361_v28 }
  0x97   : > { %v411_v27 = vadd.f32 %v407_v25, %v386_v24 }
  0x99   : > { %737 = vtanh.f32 %v411_v27 }
  0x9b   : > { %v516_v16 = vpop.permute.xlu2 %515 }
  0x9c   : > { %v397_v30 = vpop.permute.xlu0 %396 }
  0x9d   : > { %v406_v32 = vmul.f32 %v403_v20, %v397_v30  ;;  %v341_v33 = vpop.permute.xlu1 %340  ;;  %v563_v30 = vld [vmem:[%s1056_s7] sm:$0x1] }
  0x9e   : > { %v359_v38 = vmul.f32 %v358_v18, %v341_v33 }
  0x9f   : > { %v738_v35 = vpop.eup %737  ;;  %v410_v36 = vadd.f32 %v406_v32, %v385_v31 }
  0xa0   : > { %469 = vmatpush.msra.mxu0 %v738_v35  ;;  %679 = vmatpush.msra.mxu3 %v738_v35  ;;  %v383_v47 = vadd.f32 %v366_v43, %v359_v38 }
  0xa1   : > { %739 = vtanh.f32 %v410_v36 }
  0xa3   : > { %v506_v22 = vpop.permute.xlu2 %505 }
  0xa4   : > { %v389_v39 = vpop.permute.xlu0 %388 }
  0xa5   : > { %v404_v40 = vmul.f32 %v403_v20, %v389_v39 }
  0xa6   : > { %v393_v44 = vpop.permute.xlu1 %392 }
  0xa7   : > { %v740_v45 = vpop.eup %739  ;;  %v405_v48 = vmul.f32 %v403_v20, %v393_v44  ;;  %v408_v49 = vadd.f32 %v404_v40, %v383_v47 }
  0xa8   : > { %470 = vmatpush.msra.mxu0 %v740_v45  ;;  %680 = vmatpush.msra.mxu3 %v740_v45 }
  0xa9   : > { %v409_v50 = vadd.f32 %v405_v48, %v384_v46 }
  0xab   : > { %741 = vtanh.f32 %v409_v50 }
  0xac   : > { %743 = vtanh.f32 %v408_v49 }
  0xad   : > { %v432_v63 = vpop.permute.xlu0 %431 }
  0xaf   : > { %v442_v61 = vpop.permute.xlu1 %441 }
  0xb1   : > { %v742_v53 = vpop.eup %741 }
  0xb2   : > { %471 = vmatpush.msra.mxu0 %v742_v53  ;;  %681 = vmatpush.msra.mxu3 %v742_v53  ;;  %v744_v56 = vpop.eup %743 }
  0xb4   : > { %472 = vmatpush.msra.mxu0 %v744_v56  ;;  %682 = vmatpush.msra.mxu3 %v744_v56 }
  0xb5   : > { %669 = vmatmul.msk.f32.vlgmr.msra.gmra.mxu3 %vm444_vm0, %v417_v54  ;;  %668 = vmatmul.msk.f32.vlgmr.msra.gmra.mxu0 %vm444_vm0, %v416_v55  ;;  %v501_v25 = vpop.permute.xlu0 %500 }
  0xb7   : > { %v427_v5 = vpop.permute.xlu1 %426 }
  0xbd   : > { %670 = vmatmul.msk.f32.gmra.mxu3 %vm444_vm0, %v418_v57 }
  0xbf   : > { %v511_v18 = vpop.permute.xlu1 %510 }
  0xc5   : > { %671 = vmatmul.msk.f32.gmra.mxu3 %vm444_vm0, %v419_v58 }
  0xc7   : > { %v568_v32 = vpop.permute.xlu1 %567 }
  0xc8   : > { %v570_v33 = vperm.slane %v568_v32, 0 }
 0x132   : > { %v474_v3 = vpop.f32.mrf.mxu0 }
 0x133   : > { %v475_v6 = vadd.f32 %v474_v3, %v427_v5 }
 0x138   : > { %v477_v59 = vpop.f32.mrf.mxu3 }
 0x139   : > { %v478_v4 = vadd.f32 %v477_v59, %v432_v63 }
 0x140   : > { %v480_v60 = vpop.f32.mrf.mxu3 }
 0x141   : > { %v481_v1 = vadd.f32 %v480_v60, %v437_v62 }
 0x148   : > { %v483_v0 = vpop.f32.mrf.mxu3 }
 0x149   : > { %v484_v2 = vadd.f32 %v483_v0, %v442_v61 }
 0x14b   : > { %745 = vtanh.f32 %v484_v2 }
 0x14c   : > { %747 = vtanh.f32 %v481_v1 }
 0x14d   : > { %749 = vtanh.f32 %v478_v4 }
 0x14e   : > { %751 = vtanh.f32 %v475_v6 }
 0x151   : > { %v746_v7 = vpop.eup %745 }
 0x152   : > { %542 = vmatpush.msrb.mxu0 %v746_v7  ;;  %683 = vmatpush.msra.mxu1 %v746_v7  ;;  %v748_v8 = vpop.eup %747 }
 0x153   : > { %v750_v9 = vpop.eup %749 }
 0x154   : > { %543 = vmatpush.msrb.mxu0 %v748_v8  ;;  %684 = vmatpush.msra.mxu1 %v748_v8  ;;  %v752_v12 = vpop.eup %751 }
 0x156   : > { %544 = vmatpush.msrb.mxu0 %v750_v9  ;;  %685 = vmatpush.msra.mxu1 %v750_v9 }
 0x158   : > { %545 = vmatpush.msrb.mxu0 %v752_v12  ;;  %686 = vmatpush.msra.mxu1 %v752_v12 }
 0x159   : > { %672 = vmatmul.msk.f32.vlgmr.msrb.gmra.mxu0 %vm444_vm0, %v490_v10  ;;  %673 = vmatmul.msk.f32.vlgmr.msra.gmra.mxu1 %vm444_vm0, %v491_v11 }
 0x161   : > { %674 = vmatmul.msk.f32.gmra.mxu1 %vm444_vm0, %v492_v13 }
 0x169   : > { %675 = vmatmul.msk.f32.gmra.mxu1 %vm444_vm0, %v493_v14 }
 0x1d6   : > { %v550_v15 = vpop.f32.mrf.mxu1  ;;  %v547_v23 = vpop.f32.mrf.mxu0 }
 0x1d7   : > { %v551_v24 = vadd.f32 %v550_v15, %v506_v22  ;;  %v548_v26 = vadd.f32 %v547_v23, %v501_v25 }
 0x1de   : > { %v553_v17 = vpop.f32.mrf.mxu1 }
 0x1df   : > { %v554_v20 = vadd.f32 %v553_v17, %v511_v18 }
 0x1e6   : > { %v556_v19 = vpop.f32.mrf.mxu1 }
 0x1e7   : > { %v557_v21 = vadd.f32 %v556_v19, %v516_v16 }
 0x1e9   : > { %753 = vtanh.f32 %v557_v21 }
 0x1ea   : > { %755 = vtanh.f32 %v554_v20 }
 0x1eb   : > { %757 = vtanh.f32 %v551_v24 }
 0x1ec   : > { %759 = vtanh.f32 %v548_v26 }
 0x1ef   : > { %v754_v27 = vpop.eup %753 }
 0x1f0   : > { %586 = vmatpush.msra.mxu2 %v754_v27  ;;  %v756_v28 = vpop.eup %755 }
 0x1f1   : > { %v758_v29 = vpop.eup %757 }
 0x1f2   : > { %587 = vmatpush.msra.mxu2 %v756_v28  ;;  %v760_v31 = vpop.eup %759 }
 0x1f4   : > { %588 = vmatpush.msra.mxu2 %v758_v29 }
 0x1f6   : > { %589 = vmatpush.msra.mxu2 %v760_v31 }
 0x1f7   : > { %676 = vmatmul.msk.f32.vlgmr.msra.gmra.mxu2 %vm444_vm0, %v563_v30 }
 0x27a   : > { %v591_v34 = vpop.f32.mrf.mxu2 }
 0x27b   : > { %v592_v35 = vadd.f32 %v591_v34, %v570_v33 }
 0x27d   : > { %594 = vst [vmem:[%s324_s29] sm:$0x1] %v592_v35 }
 0x27e   : > { %788 = shalt.err (!%p785_p3)
}
 0x27f   : > { %687 = dma.vmem_to_hbm [thread:$0]  (%p918_p5), %s607_s30, 16, %s609_s10, %s596_s15  }
 0x280 PF: > { %p693_p4 = scmp.ge.s32.totalorder %s823_s14, 2  ;;  %s620_s25 = sand.u32 1, %s811_s11  }
 0x281   : > { %s621_s27 = scalar_lea.sflag [#allocation4], %s620_s25 }
 0x282   : > { %p690_p7 = pnand %p693_p4, %p922_p6 }
 0x284   : > { %p691_p8 = pneg %p690_p7 }
 0x286   : > { %806 = dma.done.wait (%p691_p8), %s621_s27, 16  }
 0x287   : > { %808 = vsyncadd (%p691_p8), %s621_s27, 4294967280  ;;  %p21_p9 = scmp.ge.s32.totalorder %s905_s16, 4   ;;  %s1061_s11 = smov %s815_s12 }
 0x288   : > { %s1062_s12 = smov %s819_s13  ;;  %s1063_s13 = smov %s916_s19 }
 0x289   : > { %s1064_s14 = smov %s905_s16  ;;  %23 = sbr.rel (!%p21_p9) target bundleno = 6 (0x6), region = 91 }
 0x28e   :  { %626 = vsyncpa [#allocation4], 1 }
 0x28f   :  { %628 = vsyncpa [#allocation4 + $0x1], 1 }

</bundles_post_ra>
